<compile_context>
chip_gen: v7x
topology: tpu7x:2x2x1
jax: 0.10.0
libtpu: 0.0.40
codegen_flags: <defaults>
</compile_context>

<pallas_src>
import functools

import jax
import jax.numpy as jnp
from jax.experimental import pallas as pl
from jax.experimental.pallas import tpu as pltpu

LANES = 128
MAX_BLOCK_ROWS = 8192          # 8192 * 128 f32 = 4 MiB per input block
MAX_SLICES = 2                 # leading "parallel" axis; one per TC on v7x
VMEM_LIMIT_BYTES = 48 << 20    # < v7x 64 MiB physical, << v5e/v6e 128 MiB


def _num_tensorcores():
    """Best-effort TensorCore count (2 on v7x, 1 on v5e/v6e)."""
    try:
        info = pltpu.get_tpu_info()
        for attr in ("num_cores", "core_count", "num_tensorcores"):
            v = getattr(info, attr, None)
            if isinstance(v, int) and v > 0:
                return v
    except Exception:
        pass
    return MAX_SLICES


def _dice_kernel(x_ref, y_ref, inter_ref, denom_ref, acc_i_ref, acc_d_ref, *,
                 rows):
    s = pl.program_id(0)             # slice (parallel axis)
    i = pl.program_id(1)             # step within slice (reduction axis)
    block_rows = x_ref.shape[0]
    groups = block_rows // 8         # block_rows is always a multiple of 8

    @pl.when(i == 0)
    def _():
        acc_i_ref[...] = jnp.zeros_like(acc_i_ref)
        acc_d_ref[...] = jnp.zeros_like(acc_d_ref)

    x = x_ref[...].astype(jnp.float32)
    y = y_ref[...].astype(jnp.float32)

    # Unclamped global row offset of this step.  The index_map clamps the DMA
    # so it never reads out of bounds; here redundant steps (valid <= 0)
    # contribute nothing and the ragged edge block is masked.
    row0 = (s * pl.num_programs(1) + i) * block_rows
    valid = rows - row0

    def _accum(xv, yv):
        # Fold (block_rows, 128) -> (8, 128): pure vreg adds on the VPU, no
        # block-shaped accumulator traffic (perf-review item 1).
        acc_i_ref[...] += jnp.sum((xv * yv).reshape(groups, 8, LANES), axis=0)
        acc_d_ref[...] += jnp.sum((xv + yv).reshape(groups, 8, LANES), axis=0)

    @pl.when(valid >= block_rows)    # full block: unmasked elementwise work
    def _():
        _accum(x, y)

    @pl.when(jnp.logical_and(valid > 0, valid < block_rows))  # ragged edge
    def _():
        rid = jax.lax.broadcasted_iota(jnp.int32, x.shape, 0)
        m = rid < valid
        _accum(jnp.where(m, x, 0.0), jnp.where(m, y, 0.0))

    # Epilogue: one (8,128)-aligned store of each partial per slice.
    @pl.when(i == pl.num_programs(1) - 1)
    def _():
        inter_ref[...] = acc_i_ref[...]
        denom_ref[...] = acc_d_ref[...]


def dice_loss(inputs, targets, smooth=1e-6):
    """Pallas TPU implementation of DiceLoss.forward."""
    x = jnp.ravel(inputs)            # native dtype; ravel/reshape are free
    y = jnp.ravel(targets)
    n = x.shape[0]

    n_main = (n // LANES) * LANES
    tail_inter = jnp.float32(0.0)
    tail_denom = jnp.float32(0.0)
    if n_main != n:
        # <128-element tail handled in plain JAX (no full-array pad copy).
        xt = x[n_main:].astype(jnp.float32)
        yt = y[n_main:].astype(jnp.float32)
        tail_inter = jnp.sum(xt * yt)
        tail_denom = jnp.sum(xt) + jnp.sum(yt)
        # TODO(synk): the prefix slice below may still materialize one copy of
        # the main chunk at the pallas_call boundary; still cheaper than
        # padding+copying both full arrays.
        x = x[:n_main]
        y = y[:n_main]

    rows = n_main // LANES
    if rows < 8:
        # Tiny input: grid/step overhead dominates; plain JAX is faster.
        xf = x.astype(jnp.float32)
        yf = y.astype(jnp.float32)
        inter = jnp.sum(xf * yf) + tail_inter
        denom = jnp.sum(xf) + jnp.sum(yf) + tail_denom
        dice = (2.0 * inter + smooth) / (denom + smooth)
        return (1.0 - dice).astype(jnp.float32)

    x2 = x.reshape(rows, LANES)
    y2 = y.reshape(rows, LANES)

    # Block rows: multiple of 8 (folds cleanly into the (8,128) accumulator),
    # as large as possible, capped at 8192 rows for v7x's 64 MiB VMEM.
    block_rows = min(MAX_BLOCK_ROWS, (rows // 8) * 8)
    n_blocks = pl.cdiv(rows, block_rows)
    num_slices = max(1, min(_num_tensorcores(), MAX_SLICES, n_blocks))
    steps = pl.cdiv(n_blocks, num_slices)

    def in_map(s, i):
        # Clamp so redundant trailing steps of the last slice never DMA out of
        # bounds; their contribution is masked to zero inside the kernel.
        return (jnp.minimum(s * steps + i, n_blocks - 1), 0)

    out_map = lambda s, i: (s, 0)
    part_shape = jax.ShapeDtypeStruct((num_slices * 8, LANES), jnp.float32)

    kernel = functools.partial(_dice_kernel, rows=rows)

    inter_p, denom_p = pl.pallas_call(
        kernel,
        out_shape=(part_shape, part_shape),
        grid_spec=pltpu.PrefetchScalarGridSpec(
            num_scalar_prefetch=0,
            grid=(num_slices, steps),
            in_specs=[
                pl.BlockSpec((block_rows, LANES), in_map),
                pl.BlockSpec((block_rows, LANES), in_map),
            ],
            out_specs=(
                pl.BlockSpec((8, LANES), out_map),
                pl.BlockSpec((8, LANES), out_map),
            ),
            scratch_shapes=[
                pltpu.VMEM((8, LANES), jnp.float32),
                pltpu.VMEM((8, LANES), jnp.float32),
            ],
        ),
        # TODO(synk): on v7x, if profiling shows one TensorCore idle, switch
        # axis 0 to pltpu.CORE_PARALLEL (or pl.core_map over a TC mesh).
        compiler_params=pltpu.CompilerParams(
            dimension_semantics=("parallel", "arbitrary"),
            vmem_limit_bytes=VMEM_LIMIT_BYTES),
    )(x2, y2)

    intersection = jnp.sum(inter_p) + tail_inter
    denominator = jnp.sum(denom_p) + tail_denom
    dice = (2.0 * intersection + smooth) / (denominator + smooth)
    return (1.0 - dice).astype(jnp.float32)


def dice_loss_ref(inputs, targets, smooth=1e-6):
    x = jnp.ravel(inputs).astype(jnp.float32)
    y = jnp.ravel(targets).astype(jnp.float32)
    inter = jnp.sum(x * y)
    dice = (2.0 * inter + smooth) / (jnp.sum(x) + jnp.sum(y) + smooth)
    return 1.0 - dice


if __name__ == "__main__":
    key = jax.random.PRNGKey(0)
    k1, k2, k3, k4 = jax.random.split(key, 4)

    # Typical segmentation shapes: probabilities vs binary targets, NCHW.
    inputs = jax.nn.sigmoid(jax.random.normal(k1, (2, 4, 16, 16), jnp.float32))
    targets = (jax.random.uniform(k2, (2, 4, 16, 16)) > 0.5).astype(jnp.float32)
    loss = jax.block_until_ready(dice_loss(inputs, targets))
    ref = jax.block_until_ready(dice_loss_ref(inputs, targets))
    assert jnp.allclose(loss, ref, atol=1e-5, rtol=1e-5), (loss, ref)

    # Lane-unaligned shape (1155 elements): exercises the ragged edge-block
    # masking path and the JAX-side tail sum.
    inputs2 = jax.nn.sigmoid(jax.random.normal(k3, (3, 5, 7, 11), jnp.float32))
    targets2 = (jax.random.uniform(k4, (3, 5, 7, 11)) > 0.5).astype(jnp.float32)
    loss2 = jax.block_until_ready(dice_loss(inputs2, targets2))
    ref2 = jax.block_until_ready(dice_loss_ref(inputs2, targets2))
    assert jnp.allclose(loss2, ref2, atol=1e-5, rtol=1e-5), (loss2, ref2)

    print("KERNEL_OK")
</pallas_src>

<mosaic_0001>
module attributes {stable_mosaic.version = 11 : i64} {
  func.func @_dice_kernel(%arg0: i32, %arg1: i32, %arg2: memref<16x128xf32, #tpu.memory_space<vmem>>, %arg3: memref<16x128xf32, #tpu.memory_space<vmem>>, %arg4: memref<8x128xf32, #tpu.memory_space<vmem>>, %arg5: memref<8x128xf32, #tpu.memory_space<vmem>>, %arg6: memref<8x128xf32, #tpu.memory_space<vmem>>, %arg7: memref<8x128xf32, #tpu.memory_space<vmem>>) attributes {dimension_semantics = [#tpu.dimension_semantics<parallel>, #tpu.dimension_semantics<arbitrary>], iteration_bounds = array<i64: 1, 1>, scalar_prefetch = 0 : i64, scratch_operands = 2 : i64, tpu.core_type = #tpu.core_type<tc>, window_params = [{transform_indices = @transform_0, window_bounds = array<i64: 16, 128>}, {transform_indices = @transform_1, window_bounds = array<i64: 16, 128>}, {transform_indices = @transform_2, window_bounds = array<i64: 8, 128>}, {transform_indices = @transform_3, window_bounds = array<i64: 8, 128>}]} {
    %c0_i32 = arith.constant 0 : i32
    %0 = arith.cmpi eq, %arg1, %c0_i32 : i32
    %1 = arith.extui %0 : i1 to i32
    %c0_i32_0 = arith.constant 0 : i32
    %2 = arith.cmpi ne, %1, %c0_i32_0 : i32
    scf.if %2 {
      %cst = arith.constant 0.000000e+00 : f32
      %20 = vector.broadcast %cst : f32 to vector<8x128xf32>
      %c0_12 = arith.constant 0 : index
      %c0_13 = arith.constant 0 : index
      %21 = vector.load %arg6[%c0_12, %c0_13] : memref<8x128xf32, #tpu.memory_space<vmem>>, vector<8x128xf32>
      tpu.vector_store %arg6[%c0_12, %c0_13], %20 {strides = array<i32>} : memref<8x128xf32, #tpu.memory_space<vmem>>, vector<8x128xf32>,
      %cst_14 = arith.constant 0.000000e+00 : f32
      %22 = vector.broadcast %cst_14 : f32 to vector<8x128xf32>
      %c0_15 = arith.constant 0 : index
      %c0_16 = arith.constant 0 : index
      %23 = vector.load %arg7[%c0_15, %c0_16] : memref<8x128xf32, #tpu.memory_space<vmem>>, vector<8x128xf32>
      tpu.vector_store %arg7[%c0_15, %c0_16], %22 {strides = array<i32>} : memref<8x128xf32, #tpu.memory_space<vmem>>, vector<8x128xf32>,
    } else {
    }
    %c0 = arith.constant 0 : index
    %c0_1 = arith.constant 0 : index
    %3 = vector.load %arg2[%c0, %c0_1] : memref<16x128xf32, #tpu.memory_space<vmem>>, vector<16x128xf32>
    %c0_2 = arith.constant 0 : index
    %c0_3 = arith.constant 0 : index
    %4 = vector.load %arg3[%c0_2, %c0_3] : memref<16x128xf32, #tpu.memory_space<vmem>>, vector<16x128xf32>
    %c1_i32 = arith.constant 1 : i32
    %5 = arith.muli %arg0, %c1_i32 : i32
    %6 = arith.addi %5, %arg1 : i32
    %c16_i32 = arith.constant 16 : i32
    %7 = arith.muli %6, %c16_i32 : i32
    %c16_i32_4 = arith.constant 16 : i32
    %8 = arith.subi %c16_i32_4, %7 : i32
    %c16_i32_5 = arith.constant 16 : i32
    %9 = arith.cmpi sge, %8, %c16_i32_5 : i32
    %10 = arith.extui %9 : i1 to i32
    %c0_i32_6 = arith.constant 0 : i32
    %11 = arith.cmpi ne, %10, %c0_i32_6 : i32
    scf.if %11 {
      %c0_12 = arith.constant 0 : index
      %c0_13 = arith.constant 0 : index
      %20 = vector.load %arg6[%c0_12, %c0_13] : memref<8x128xf32, #tpu.memory_space<vmem>>, vector<8x128xf32>
      %21 = arith.mulf %3, %4 : vector<16x128xf32>
      %22 = vector.shape_cast %21 : vector<16x128xf32> to vector<2x8x128xf32>
      %cst = arith.constant dense<0.000000e+00> : vector<8x128xf32>
      %23 = vector.multi_reduction <add>, %22, %cst [0] : vector<2x8x128xf32> to vector<8x128xf32>
      %24 = arith.addf %20, %23 : vector<8x128xf32>
      %c0_14 = arith.constant 0 : index
      %c0_15 = arith.constant 0 : index
      %25 = vector.load %arg6[%c0_14, %c0_15] : memref<8x128xf32, #tpu.memory_space<vmem>>, vector<8x128xf32>
      tpu.vector_store %arg6[%c0_14, %c0_15], %24 {strides = array<i32>} : memref<8x128xf32, #tpu.memory_space<vmem>>, vector<8x128xf32>,
      %c0_16 = arith.constant 0 : index
      %c0_17 = arith.constant 0 : index
      %26 = vector.load %arg7[%c0_16, %c0_17] : memref<8x128xf32, #tpu.memory_space<vmem>>, vector<8x128xf32>
      %27 = arith.addf %3, %4 : vector<16x128xf32>
      %28 = vector.shape_cast %27 : vector<16x128xf32> to vector<2x8x128xf32>
      %cst_18 = arith.constant dense<0.000000e+00> : vector<8x128xf32>
      %29 = vector.multi_reduction <add>, %28, %cst_18 [0] : vector<2x8x128xf32> to vector<8x128xf32>
      %30 = arith.addf %26, %29 : vector<8x128xf32>
      %c0_19 = arith.constant 0 : index
      %c0_20 = arith.constant 0 : index
      %31 = vector.load %arg7[%c0_19, %c0_20] : memref<8x128xf32, #tpu.memory_space<vmem>>, vector<8x128xf32>
      tpu.vector_store %arg7[%c0_19, %c0_20], %30 {strides = array<i32>} : memref<8x128xf32, #tpu.memory_space<vmem>>, vector<8x128xf32>,
    } else {
    }
    %c0_i32_7 = arith.constant 0 : i32
    %12 = arith.cmpi sgt, %8, %c0_i32_7 : i32
    %c16_i32_8 = arith.constant 16 : i32
    %13 = arith.cmpi slt, %8, %c16_i32_8 : i32
    %14 = arith.andi %12, %13 : i1
    %15 = arith.extui %14 : i1 to i32
    %c0_i32_9 = arith.constant 0 : i32
    %16 = arith.cmpi ne, %15, %c0_i32_9 : i32
    scf.if %16 {
      %20 = tpu.iota {dimensions = array<i32: 0>} : vector<16x128xi32>
      %21 = vector.broadcast %8 : i32 to vector<16x128xi32>
      %22 = arith.cmpi slt, %20, %21 : vector<16x128xi32>
      %cst = arith.constant 0.000000e+00 : f32
      %23 = vector.broadcast %cst : f32 to vector<16x128xf32>
      %24 = arith.select %22, %3, %23 : vector<16x128xi1>, vector<16x128xf32>
      %cst_12 = arith.constant 0.000000e+00 : f32
      %25 = vector.broadcast %cst_12 : f32 to vector<16x128xf32>
      %26 = arith.select %22, %4, %25 : vector<16x128xi1>, vector<16x128xf32>
      %c0_13 = arith.constant 0 : index
      %c0_14 = arith.constant 0 : index
      %27 = vector.load %arg6[%c0_13, %c0_14] : memref<8x128xf32, #tpu.memory_space<vmem>>, vector<8x128xf32>
      %28 = arith.mulf %24, %26 : vector<16x128xf32>
      %29 = vector.shape_cast %28 : vector<16x128xf32> to vector<2x8x128xf32>
      %cst_15 = arith.constant dense<0.000000e+00> : vector<8x128xf32>
      %30 = vector.multi_reduction <add>, %29, %cst_15 [0] : vector<2x8x128xf32> to vector<8x128xf32>
      %31 = arith.addf %27, %30 : vector<8x128xf32>
      %c0_16 = arith.constant 0 : index
      %c0_17 = arith.constant 0 : index
      %32 = vector.load %arg6[%c0_16, %c0_17] : memref<8x128xf32, #tpu.memory_space<vmem>>, vector<8x128xf32>
      tpu.vector_store %arg6[%c0_16, %c0_17], %31 {strides = array<i32>} : memref<8x128xf32, #tpu.memory_space<vmem>>, vector<8x128xf32>,
      %c0_18 = arith.constant 0 : index
      %c0_19 = arith.constant 0 : index
      %33 = vector.load %arg7[%c0_18, %c0_19] : memref<8x128xf32, #tpu.memory_space<vmem>>, vector<8x128xf32>
      %34 = arith.addf %24, %26 : vector<16x128xf32>
      %35 = vector.shape_cast %34 : vector<16x128xf32> to vector<2x8x128xf32>
      %cst_20 = arith.constant dense<0.000000e+00> : vector<8x128xf32>
      %36 = vector.multi_reduction <add>, %35, %cst_20 [0] : vector<2x8x128xf32> to vector<8x128xf32>
      %37 = arith.addf %33, %36 : vector<8x128xf32>
      %c0_21 = arith.constant 0 : index
      %c0_22 = arith.constant 0 : index
      %38 = vector.load %arg7[%c0_21, %c0_22] : memref<8x128xf32, #tpu.memory_space<vmem>>, vector<8x128xf32>
      tpu.vector_store %arg7[%c0_21, %c0_22], %37 {strides = array<i32>} : memref<8x128xf32, #tpu.memory_space<vmem>>, vector<8x128xf32>,
    } else {
    }
    %c0_i32_10 = arith.constant 0 : i32
    %17 = arith.cmpi eq, %arg1, %c0_i32_10 : i32
    %18 = arith.extui %17 : i1 to i32
    %c0_i32_11 = arith.constant 0 : i32
    %19 = arith.cmpi ne, %18, %c0_i32_11 : i32
    scf.if %19 {
      %c0_12 = arith.constant 0 : index
      %c0_13 = arith.constant 0 : index
      %20 = vector.load %arg6[%c0_12, %c0_13] : memref<8x128xf32, #tpu.memory_space<vmem>>, vector<8x128xf32>
      %c0_14 = arith.constant 0 : index
      %c0_15 = arith.constant 0 : index
      %21 = vector.load %arg4[%c0_14, %c0_15] : memref<8x128xf32, #tpu.memory_space<vmem>>, vector<8x128xf32>
      tpu.vector_store %arg4[%c0_14, %c0_15], %20 {strides = array<i32>} : memref<8x128xf32, #tpu.memory_space<vmem>>, vector<8x128xf32>,
      %c0_16 = arith.constant 0 : index
      %c0_17 = arith.constant 0 : index
      %22 = vector.load %arg7[%c0_16, %c0_17] : memref<8x128xf32, #tpu.memory_space<vmem>>, vector<8x128xf32>
      %c0_18 = arith.constant 0 : index
      %c0_19 = arith.constant 0 : index
      %23 = vector.load %arg5[%c0_18, %c0_19] : memref<8x128xf32, #tpu.memory_space<vmem>>, vector<8x128xf32>
      tpu.vector_store %arg5[%c0_18, %c0_19], %22 {strides = array<i32>} : memref<8x128xf32, #tpu.memory_space<vmem>>, vector<8x128xf32>,
    } else {
    }
    return
  }
  func.func @transform_0(%arg0: i32, %arg1: i32) -> (i32, i32) {
    %c1_i32 = arith.constant 1 : i32
    %0 = arith.muli %arg0, %c1_i32 : i32
    %1 = arith.addi %0, %arg1 : i32
    %c0_i32 = arith.constant 0 : i32
    %2 = arith.minsi %1, %c0_i32 : i32
    %c0_i32_0 = arith.constant 0 : i32
    %c0_i32_1 = arith.constant 0 : i32
    return %2, %c0_i32_0 : i32, i32
  }
  func.func @transform_1(%arg0: i32, %arg1: i32) -> (i32, i32) {
    %c1_i32 = arith.constant 1 : i32
    %0 = arith.muli %arg0, %c1_i32 : i32
    %1 = arith.addi %0, %arg1 : i32
    %c0_i32 = arith.constant 0 : i32
    %2 = arith.minsi %1, %c0_i32 : i32
    %c0_i32_0 = arith.constant 0 : i32
    %c0_i32_1 = arith.constant 0 : i32
    return %2, %c0_i32_0 : i32, i32
  }
  func.func @transform_2(%arg0: i32, %arg1: i32) -> (i32, i32) {
    %c0_i32 = arith.constant 0 : i32
    %c0_i32_0 = arith.constant 0 : i32
    return %arg0, %c0_i32 : i32, i32
  }
  func.func @transform_3(%arg0: i32, %arg1: i32) -> (i32, i32) {
    %c0_i32 = arith.constant 0 : i32
    %c0_i32_0 = arith.constant 0 : i32
    return %arg0, %c0_i32 : i32, i32
  }
}

</mosaic_0001>

<bundles_post_ra>
// kernel: tpu_custom_call.1
= control target key start
LH: loop header
LB: loop body
LE: loop exit
PB: predicated region body
PF: predicated region fallthrough
CT: control target
= control target key end

     0   :  { %9 = vsyncpa [#allocation5], 0  ;;  %s337_s0 = inlined_call_operand.hbm [shape: f32[16,128], index: 0, kind: input, shape index: {}]   ;;  %s338_s1 = inlined_call_operand.hbm [shape: f32[16,128], index: 1, kind: input, shape index: {}]   ;;  %s339_s2 = inlined_call_operand.hbm [shape: f32[8,128], index: 2, kind: output, shape index: {0}]   ;;  %s340_s3 = inlined_call_operand.hbm [shape: f32[8,128], index: 3, kind: output, shape index: {1}]  }
   0x1   :  { %10 = vsyncpa [#allocation8], 0 }
   0x2   :  { %11 = vsyncpa [#allocation6], 0 }
   0x3   :  { %12 = vsyncpa [#allocation11], 0  ;;  %s263_s12 = smov [#allocation4]   ;;  %s167_s16 = scalar_lea.hbm %s337_s0, 256 }
   0x4   :  { %s24_s13 = sshll.u32 %s263_s12, 4  ;;  %p168_p0 = scmp.ne.s32.totalorder %s337_s0, %s167_s16  ;;  %s25_s13 = int_to_ptr.vmem [resolvable:$true] %s24_s13 }
   0x5   :  { %p171_p1 = scmp.lt.u32.totalorder %s167_s16, %s337_s0 }
   0x7   :  { %p173_p2 = pnand %p171_p1, %p168_p0 }
   0x9   :  { %176 = shalt.err (!%p173_p2)
}
   0xa   :  { %s177_s21 = scalar_lea.vmem %s25_s13, 256  ;;  %p182_p4 = scmp.lt.s32.totalorder %s25_s13, %s25_s13 }
   0xb   :  { %p178_p3 = scmp.ne.s32.totalorder %s25_s13, %s177_s21  ;;  %p183_p5 = scmp.lt.s32.totalorder %s177_s21, %s177_s21 }
   0xd   :  { %p184_p6 = por %p183_p5, %p182_p4 }
   0xf   :  { %p185_p7 = pnand %p184_p6, %p178_p3 }
  0x11   :  { %188 = shalt.err (!%p185_p7)
}
  0x12   :  { %s264_s22 = smov 128   ;;  %s265_s23 = smov 8  }
  0x13   :  { %30 = dma.hbm_to_vmem [thread:$0]  %s337_s0, 256, %s25_s13, [#allocation5], %s264_s22, %s264_s22, %s265_s23  }
  0x14   :  { %s266_s26 = smov [#allocation7]   ;;  %s189_s30 = scalar_lea.hbm %s338_s1, 256 }
  0x15   :  { %s42_s27 = sshll.u32 %s266_s26, 4  ;;  %p190_p8 = scmp.ne.s32.totalorder %s338_s1, %s189_s30  ;;  %s43_s27 = int_to_ptr.vmem [resolvable:$true] %s42_s27 }
  0x16   :  { %p193_p9 = scmp.lt.u32.totalorder %s189_s30, %s338_s1 }
  0x18   :  { %p195_p10 = pnand %p193_p9, %p190_p8 }
  0x1a   :  { %198 = shalt.err (!%p195_p10)
}
  0x1b   :  { %s199_s8 = scalar_lea.vmem %s43_s27, 256  ;;  %p204_p12 = scmp.lt.s32.totalorder %s43_s27, %s43_s27 }
  0x1c   :  { %p200_p11 = scmp.ne.s32.totalorder %s43_s27, %s199_s8  ;;  %p205_p13 = scmp.lt.s32.totalorder %s199_s8, %s199_s8 }
  0x1e   :  { %p206_p0 = por %p205_p13, %p204_p12 }
  0x20   :  { %p207_p1 = pnand %p206_p0, %p200_p11 }
  0x22   :  { %210 = shalt.err (!%p207_p1)
}
  0x23   :  { %48 = dma.hbm_to_vmem [thread:$0]  %s338_s1, 256, %s43_s27, [#allocation8], %s264_s22, %s264_s22, %s265_s23  }
  0x24   :  { %255 = dma.done.wait [#allocation5], 256  }
  0x25   :  { %256 = vsyncadd [#allocation5], 4294967040 }
  0x26   :  { %257 = dma.done.wait [#allocation8], 256  }
  0x27   :  { %258 = vsyncadd [#allocation8], 4294967040  ;;  %v69_v0 = vld [vmem:[#allocation4] sm:$0xff]  ;;  %v70_v1 = vld [vmem:[#allocation4 + $0x8] sm:$0xff]  ;;  %s267_s10 = smov [#allocation9]   ;;  %s268_s12 = smov [#allocation10]  }
  0x28   :  { %v71_v2 = vld [vmem:[#allocation7] sm:$0xff]  ;;  %v72_v3 = vld [vmem:[#allocation7 + $0x8] sm:$0xff]  ;;  %s133_s11 = sshll.u32 %s267_s10, 4  ;;  %s143_s13 = sshll.u32 %s268_s12, 4  ;;  %s134_s11 = int_to_ptr.vmem [resolvable:$true] %s133_s11  ;;  %s144_s13 = int_to_ptr.vmem [resolvable:$true] %s143_s13 }
  0x29   :  { %v81_v4 = vmul.f32 %v71_v2, %v69_v0  ;;  %v87_v5 = vadd.f32 %v71_v2, %v69_v0  ;;  %v82_v6 = vmul.f32 %v72_v3, %v70_v1  ;;  %v88_v7 = vadd.f32 %v72_v3, %v70_v1  ;;  %s211_s1 = scalar_lea.vmem %s134_s11, 128  ;;  %p216_p3 = scmp.lt.s32.totalorder %s134_s11, %s134_s11 }
  0x2a   :  { %p212_p2 = scmp.ne.s32.totalorder %s134_s11, %s211_s1  ;;  %p217_p4 = scmp.lt.s32.totalorder %s211_s1, %s211_s1 }
  0x2b   :  { %v83_v8 = vadd.f32 %v82_v6, %v81_v4  ;;  %v89_v9 = vadd.f32 %v88_v7, %v87_v5 }
  0x2c   :  { %p218_p5 = por %p217_p4, %p216_p3 }
  0x2d   :  { %124 = vst [vmem:[#allocation9] sm:$0xff] %v83_v8  ;;  %126 = vst [vmem:[#allocation10] sm:$0xff] %v89_v9 }
  0x2e   :  { %p219_p6 = pnand %p218_p5, %p212_p2 }
  0x30   :  { %222 = shalt.err (!%p219_p6)
}
  0x31   :  { %s223_s16 = scalar_lea.hbm %s339_s2, 128 }
  0x32   :  { %p224_p7 = scmp.ne.s32.totalorder %s339_s2, %s223_s16  ;;  %p227_p8 = scmp.lt.u32.totalorder %s223_s16, %s339_s2 }
  0x34   :  { %p229_p9 = pnand %p227_p8, %p224_p7 }
  0x36   :  { %232 = shalt.err (!%p229_p9)
}
  0x37   :  { %136 = dma.vmem_to_hbm [thread:$0]  %s134_s11, 128, %s339_s2, [#allocation6]  }
  0x38   :  { %s233_s23 = scalar_lea.vmem %s144_s13, 128  ;;  %p238_p11 = scmp.lt.s32.totalorder %s144_s13, %s144_s13 }
  0x39   :  { %p234_p10 = scmp.ne.s32.totalorder %s144_s13, %s233_s23  ;;  %p239_p12 = scmp.lt.s32.totalorder %s233_s23, %s233_s23 }
  0x3b   :  { %p240_p13 = por %p239_p12, %p238_p11 }
  0x3d   :  { %p241_p0 = pnand %p240_p13, %p234_p10 }
  0x3f   :  { %244 = shalt.err (!%p241_p0)
}
  0x40   :  { %s245_s26 = scalar_lea.hbm %s340_s3, 128 }
  0x41   :  { %p246_p1 = scmp.ne.s32.totalorder %s340_s3, %s245_s26  ;;  %p249_p2 = scmp.lt.u32.totalorder %s245_s26, %s340_s3 }
  0x43   :  { %p251_p3 = pnand %p249_p2, %p246_p1 }
  0x45   :  { %254 = shalt.err (!%p251_p3)
}
  0x46   :  { %146 = dma.vmem_to_hbm [thread:$0]  %s144_s13, 128, %s340_s3, [#allocation11]  }
  0x47   :  { %259 = dma.done.wait [#allocation6], 128  }
  0x48   :  { %260 = vsyncadd [#allocation6], 4294967168 }
  0x49   :  { %261 = dma.done.wait [#allocation11], 128  }
  0x4a   :  { %262 = vsyncadd [#allocation11], 4294967168 }
  0x4b   :  { %153 = vsyncpa [#allocation5], 1 }
  0x4c   :  { %154 = vsyncpa [#allocation8], 1 }
  0x4d   :  { %155 = vsyncpa [#allocation6], 1 }
  0x4e   :  { %156 = vsyncpa [#allocation11], 1 }

</bundles_post_ra>
